<compile_context>
chip_gen: v6e
topology: v6e:2x2x1
jax: 0.10.0
libtpu: 0.0.40
codegen_flags: <defaults>
</compile_context>

<pallas_src>
import functools

import jax
import jax.numpy as jnp
from jax.experimental import pallas as pl
from jax.experimental.pallas import tpu as pltpu


# ----------------------------------------------------------------------------
# Fused kernel: input projection + LSTM recurrence + fc_buy head (+ sigmoid).
# All operands are full-array VMEM blocks; no grid.
# ----------------------------------------------------------------------------
def _fused_trading_kernel(x_ref, wih_ref, whh_ref, b_ref, wbuy_ref, bbuy_ref,
                          out_ref, *, batch, seq_len, hidden, apply_sigmoid):
    B, T, H = batch, seq_len, hidden

    # Phase 1: time-parallel input projection for all (b, t) rows at once.
    # x_ref is (B*T, I) with row index b*T + t (the free row-major reshape of a
    # batch_first (B, T, I) tensor).
    proj = (jnp.dot(x_ref[...], wih_ref[...],
                    preferred_element_type=jnp.float32)
            + b_ref[...])                                        # (B*T, 4H)

    w_hh = whh_ref[...]                                          # (H, 4H)

    # Phase 2: the inherently-serial recurrence.  T is small and static, so a
    # fully unrolled loop keeps every h_t in vregs (no scratch / HBM traffic)
    # and all slices are static.
    # TODO(synk): for long sequences switch to lax.fori_loop + a VMEM scratch.
    h = jnp.zeros((B, H), jnp.float32)
    c = jnp.zeros((B, H), jnp.float32)
    hs = []
    for t in range(T):
        # Rows {b*T + t} of proj == x[:, t, :] @ W_ih + bias for every batch b.
        x_t = jnp.concatenate(
            [proj[b * T + t:b * T + t + 1, :] for b in range(B)], axis=0)  # (B, 4H)
        gates = x_t + jnp.dot(h, w_hh, preferred_element_type=jnp.float32)
        # PyTorch gate order (i, f, g, o).  NOTE: at H=32 these are sub-vreg
        # lane slices; pad H to a multiple of 128 if the model is scaled up.
        i_g = jax.nn.sigmoid(gates[:, 0 * H:1 * H])
        f_g = jax.nn.sigmoid(gates[:, 1 * H:2 * H])
        g_g = jnp.tanh(gates[:, 2 * H:3 * H])
        o_g = jax.nn.sigmoid(gates[:, 3 * H:4 * H])
        c = f_g * c + i_g * g_g
        h = o_g * jnp.tanh(c)
        hs.append(h)

    # Phase 3: fc_buy on the whole hidden slab (one matmul, one store).  Rows
    # are assembled in batch-major (b*T + t) order to match the output layout,
    # so no transpose is needed anywhere.
    h_slab = jnp.concatenate(
        [hs[t][b:b + 1, :] for b in range(B) for t in range(T)], axis=0)  # (B*T, H)
    logits = (jnp.dot(h_slab, wbuy_ref[...],
                      preferred_element_type=jnp.float32)
              + bbuy_ref[...])                                   # (B*T, P)
    if apply_sigmoid:
        logits = jax.nn.sigmoid(logits)
    out_ref[...] = logits.astype(out_ref.dtype)


# ----------------------------------------------------------------------------
# Full model wrapper (mirrors TradingModel.forward).
# ----------------------------------------------------------------------------
def trading_model_forward(x, params, training=False):
    """x: (B, T, input_size) batch-first, like the PyTorch module."""
    B, T, I = x.shape
    H = params["w_hh_t"].shape[0]
    P = params["w_buy_t"].shape[1]

    x2d = x.reshape(B * T, I)          # free row-major reshape, NOT a transpose
    vmem = pl.BlockSpec(memory_space=pltpu.MemorySpace.VMEM)

    out2d = pl.pallas_call(
        functools.partial(_fused_trading_kernel, batch=B, seq_len=T, hidden=H,
                          apply_sigmoid=not training),
        out_shape=jax.ShapeDtypeStruct((B * T, P), jnp.float32),
        in_specs=[vmem] * 6,
        out_specs=vmem,
    )(x2d, params["w_ih_t"], params["w_hh_t"], params["bias"],
      params["w_buy_t"], params["b_buy"])

    buy_prob = out2d.reshape(B, T, P)  # free row-major reshape
    return buy_prob, None


def init_params(key, num_products, input_size, hidden_size):
    """Deterministic init matching PyTorch shapes (weights pre-transposed)."""
    ks = jax.random.split(key, 6)
    bound = 1.0 / jnp.sqrt(hidden_size)
    u = lambda k, shape: jax.random.uniform(k, shape, jnp.float32, -bound, bound)
    w_ih = u(ks[0], (4 * hidden_size, input_size))   # PyTorch weight_ih_l0
    w_hh = u(ks[1], (4 * hidden_size, hidden_size))  # PyTorch weight_hh_l0
    b_ih = u(ks[2], (4 * hidden_size,))
    b_hh = u(ks[3], (4 * hidden_size,))
    w_buy = u(ks[4], (num_products, hidden_size))    # fc_buy.weight
    b_buy = u(ks[5], (num_products,))                # fc_buy.bias
    return {
        "w_ih_t": w_ih.T,                                   # (I, 4H)
        "w_hh_t": w_hh.T,                                   # (H, 4H)
        "bias": (b_ih + b_hh).reshape(1, 4 * hidden_size),  # (1, 4H)
        "w_buy_t": w_buy.T,                                 # (H, P)
        "b_buy": b_buy.reshape(1, num_products),            # (1, P)
    }


# Pure-JAX reference for verification.
def _reference_forward(x, params, training=False):
    B, T, _ = x.shape
    H = params["w_hh_t"].shape[0]

    def step(carry, x_t):
        h, c = carry
        gates = x_t @ params["w_ih_t"] + h @ params["w_hh_t"] + params["bias"]
        i = jax.nn.sigmoid(gates[:, 0 * H:1 * H])
        f = jax.nn.sigmoid(gates[:, 1 * H:2 * H])
        g = jnp.tanh(gates[:, 2 * H:3 * H])
        o = jax.nn.sigmoid(gates[:, 3 * H:4 * H])
        c = f * c + i * g
        h = o * jnp.tanh(c)
        return (h, c), h

    x_tm = jnp.transpose(x, (1, 0, 2))
    (_, _), h_seq = jax.lax.scan(step,
                                 (jnp.zeros((B, H)), jnp.zeros((B, H))), x_tm)
    out = h_seq @ params["w_buy_t"] + params["b_buy"]
    if not training:
        out = jax.nn.sigmoid(out)
    return jnp.transpose(out, (1, 0, 2)), None


if __name__ == "__main__":
    # Small shapes consistent with the module: batch=2, seq=8, input=16,
    # hidden=32, num_products=4.
    B, T, INPUT, HIDDEN, NPROD = 2, 8, 16, 32, 4

    key = jax.random.PRNGKey(0)
    k_x, k_p = jax.random.split(key)
    x = jax.random.normal(k_x, (B, T, INPUT), dtype=jnp.float32)
    params = init_params(k_p, NPROD, INPUT, HIDDEN)

    buy_prob, none_out = trading_model_forward(x, params, training=False)
    buy_prob = jax.block_until_ready(buy_prob)
    assert buy_prob.shape == (B, T, NPROD)
    assert none_out is None

    ref, _ = _reference_forward(x, params, training=False)
    assert jnp.allclose(buy_prob, ref, atol=1e-5, rtol=1e-5), "mismatch vs reference"

    print("KERNEL_OK")
</pallas_src>

<mosaic_0001>
module attributes {stable_mosaic.version = 11 : i64} {
  func.func @_fused_trading_kernel(%arg0: memref<16x16xf32, #tpu.memory_space<vmem>>, %arg1: memref<16x128xf32, #tpu.memory_space<vmem>>, %arg2: memref<32x128xf32, #tpu.memory_space<vmem>>, %arg3: memref<1x128xf32, #tpu.memory_space<vmem>>, %arg4: memref<32x4xf32, #tpu.memory_space<vmem>>, %arg5: memref<1x4xf32, #tpu.memory_space<vmem>>, %arg6: memref<16x4xf32, #tpu.memory_space<vmem>>) attributes {dimension_semantics = [], scalar_prefetch = 0 : i64, scratch_operands = 0 : i64, tpu.core_type = #tpu.core_type<tc>} {
    %c0 = arith.constant 0 : index
    %c0_0 = arith.constant 0 : index
    %0 = vector.load %arg0[%c0, %c0_0] : memref<16x16xf32, #tpu.memory_space<vmem>>, vector<16x16xf32>
    %c0_1 = arith.constant 0 : index
    %c0_2 = arith.constant 0 : index
    %1 = vector.load %arg1[%c0_1, %c0_2] : memref<16x128xf32, #tpu.memory_space<vmem>>, vector<16x128xf32>
    %cst = arith.constant dense<0.000000e+00> : vector<16x128xf32>
    %2 = tpu.matmul %0, %1, %cst {dimension_numbers = #tpu.dot_dimension_numbers<[1], [0], [0], [1], [0, 0, 1, 1], [], []>} : vector<16x16xf32>, vector<16x128xf32>, vector<16x128xf32> -> vector<16x128xf32>
    %c0_3 = arith.constant 0 : index
    %c0_4 = arith.constant 0 : index
    %3 = vector.load %arg3[%c0_3, %c0_4] : memref<1x128xf32, #tpu.memory_space<vmem>>, vector<1x128xf32>
    %4 = vector.broadcast %3 : vector<1x128xf32> to vector<16x128xf32>
    %5 = arith.addf %2, %4 : vector<16x128xf32>
    %c0_5 = arith.constant 0 : index
    %c0_6 = arith.constant 0 : index
    %6 = vector.load %arg2[%c0_5, %c0_6] : memref<32x128xf32, #tpu.memory_space<vmem>>, vector<32x128xf32>
    %cst_7 = arith.constant 0.000000e+00 : f32
    %7 = vector.broadcast %cst_7 : f32 to vector<2x32xf32>
    %cst_8 = arith.constant 0.000000e+00 : f32
    %8 = vector.broadcast %cst_8 : f32 to vector<2x32xf32>
    %9 = vector.extract_strided_slice %5 {offsets = [0, 0], sizes = [1, 128], strides = [1, 1]} : vector<16x128xf32> to vector<1x128xf32>
    %10 = vector.extract_strided_slice %5 {offsets = [8, 0], sizes = [1, 128], strides = [1, 1]} : vector<16x128xf32> to vector<1x128xf32>
    %11 = tpu.concatenate %9, %10 in 0 : vector<1x128xf32>, vector<1x128xf32> -> vector<2x128xf32>
    %cst_9 = arith.constant dense<0.000000e+00> : vector<2x128xf32>
    %12 = tpu.matmul %7, %6, %cst_9 {dimension_numbers = #tpu.dot_dimension_numbers<[1], [0], [0], [1], [0, 0, 1, 1], [], []>} : vector<2x32xf32>, vector<32x128xf32>, vector<2x128xf32> -> vector<2x128xf32>
    %13 = arith.addf %11, %12 : vector<2x128xf32>
    %14 = vector.extract_strided_slice %13 {offsets = [0, 0], sizes = [2, 32], strides = [1, 1]} : vector<2x128xf32> to vector<2x32xf32>
    %15 = arith.negf %14 : vector<2x32xf32>
    %16 = math.exp %15 : vector<2x32xf32>
    %cst_10 = arith.constant 1.000000e+00 : f32
    %17 = vector.broadcast %cst_10 : f32 to vector<2x32xf32>
    %18 = arith.addf %17, %16 : vector<2x32xf32>
    %19 = arith.divf %17, %18 : vector<2x32xf32>
    %20 = vector.extract_strided_slice %13 {offsets = [0, 32], sizes = [2, 32], strides = [1, 1]} : vector<2x128xf32> to vector<2x32xf32>
    %21 = arith.negf %20 : vector<2x32xf32>
    %22 = math.exp %21 : vector<2x32xf32>
    %cst_11 = arith.constant 1.000000e+00 : f32
    %23 = vector.broadcast %cst_11 : f32 to vector<2x32xf32>
    %24 = arith.addf %23, %22 : vector<2x32xf32>
    %25 = arith.divf %23, %24 : vector<2x32xf32>
    %26 = vector.extract_strided_slice %13 {offsets = [0, 64], sizes = [2, 32], strides = [1, 1]} : vector<2x128xf32> to vector<2x32xf32>
    %27 = math.tanh %26 : vector<2x32xf32>
    %28 = vector.extract_strided_slice %13 {offsets = [0, 96], sizes = [2, 32], strides = [1, 1]} : vector<2x128xf32> to vector<2x32xf32>
    %29 = arith.negf %28 : vector<2x32xf32>
    %30 = math.exp %29 : vector<2x32xf32>
    %cst_12 = arith.constant 1.000000e+00 : f32
    %31 = vector.broadcast %cst_12 : f32 to vector<2x32xf32>
    %32 = arith.addf %31, %30 : vector<2x32xf32>
    %33 = arith.divf %31, %32 : vector<2x32xf32>
    %34 = arith.mulf %25, %8 : vector<2x32xf32>
    %35 = arith.mulf %19, %27 : vector<2x32xf32>
    %36 = arith.addf %34, %35 : vector<2x32xf32>
    %37 = math.tanh %36 : vector<2x32xf32>
    %38 = arith.mulf %33, %37 : vector<2x32xf32>
    %39 = vector.extract_strided_slice %5 {offsets = [1, 0], sizes = [1, 128], strides = [1, 1]} : vector<16x128xf32> to vector<1x128xf32>
    %40 = vector.extract_strided_slice %5 {offsets = [9, 0], sizes = [1, 128], strides = [1, 1]} : vector<16x128xf32> to vector<1x128xf32>
    %41 = tpu.concatenate %39, %40 in 0 : vector<1x128xf32>, vector<1x128xf32> -> vector<2x128xf32>
    %cst_13 = arith.constant dense<0.000000e+00> : vector<2x128xf32>
    %42 = tpu.matmul %38, %6, %cst_13 {dimension_numbers = #tpu.dot_dimension_numbers<[1], [0], [0], [1], [0, 0, 1, 1], [], []>} : vector<2x32xf32>, vector<32x128xf32>, vector<2x128xf32> -> vector<2x128xf32>
    %43 = arith.addf %41, %42 : vector<2x128xf32>
    %44 = vector.extract_strided_slice %43 {offsets = [0, 0], sizes = [2, 32], strides = [1, 1]} : vector<2x128xf32> to vector<2x32xf32>
    %45 = arith.negf %44 : vector<2x32xf32>
    %46 = math.exp %45 : vector<2x32xf32>
    %cst_14 = arith.constant 1.000000e+00 : f32
    %47 = vector.broadcast %cst_14 : f32 to vector<2x32xf32>
    %48 = arith.addf %47, %46 : vector<2x32xf32>
    %49 = arith.divf %47, %48 : vector<2x32xf32>
    %50 = vector.extract_strided_slice %43 {offsets = [0, 32], sizes = [2, 32], strides = [1, 1]} : vector<2x128xf32> to vector<2x32xf32>
    %51 = arith.negf %50 : vector<2x32xf32>
    %52 = math.exp %51 : vector<2x32xf32>
    %cst_15 = arith.constant 1.000000e+00 : f32
    %53 = vector.broadcast %cst_15 : f32 to vector<2x32xf32>
    %54 = arith.addf %53, %52 : vector<2x32xf32>
    %55 = arith.divf %53, %54 : vector<2x32xf32>
    %56 = vector.extract_strided_slice %43 {offsets = [0, 64], sizes = [2, 32], strides = [1, 1]} : vector<2x128xf32> to vector<2x32xf32>
    %57 = math.tanh %56 : vector<2x32xf32>
    %58 = vector.extract_strided_slice %43 {offsets = [0, 96], sizes = [2, 32], strides = [1, 1]} : vector<2x128xf32> to vector<2x32xf32>
    %59 = arith.negf %58 : vector<2x32xf32>
    %60 = math.exp %59 : vector<2x32xf32>
    %cst_16 = arith.constant 1.000000e+00 : f32
    %61 = vector.broadcast %cst_16 : f32 to vector<2x32xf32>
    %62 = arith.addf %61, %60 : vector<2x32xf32>
    %63 = arith.divf %61, %62 : vector<2x32xf32>
    %64 = arith.mulf %55, %36 : vector<2x32xf32>
    %65 = arith.mulf %49, %57 : vector<2x32xf32>
    %66 = arith.addf %64, %65 : vector<2x32xf32>
    %67 = math.tanh %66 : vector<2x32xf32>
    %68 = arith.mulf %63, %67 : vector<2x32xf32>
    %69 = vector.extract_strided_slice %5 {offsets = [2, 0], sizes = [1, 128], strides = [1, 1]} : vector<16x128xf32> to vector<1x128xf32>
    %70 = vector.extract_strided_slice %5 {offsets = [10, 0], sizes = [1, 128], strides = [1, 1]} : vector<16x128xf32> to vector<1x128xf32>
    %71 = tpu.concatenate %69, %70 in 0 : vector<1x128xf32>, vector<1x128xf32> -> vector<2x128xf32>
    %cst_17 = arith.constant dense<0.000000e+00> : vector<2x128xf32>
    %72 = tpu.matmul %68, %6, %cst_17 {dimension_numbers = #tpu.dot_dimension_numbers<[1], [0], [0], [1], [0, 0, 1, 1], [], []>} : vector<2x32xf32>, vector<32x128xf32>, vector<2x128xf32> -> vector<2x128xf32>
    %73 = arith.addf %71, %72 : vector<2x128xf32>
    %74 = vector.extract_strided_slice %73 {offsets = [0, 0], sizes = [2, 32], strides = [1, 1]} : vector<2x128xf32> to vector<2x32xf32>
    %75 = arith.negf %74 : vector<2x32xf32>
    %76 = math.exp %75 : vector<2x32xf32>
    %cst_18 = arith.constant 1.000000e+00 : f32
    %77 = vector.broadcast %cst_18 : f32 to vector<2x32xf32>
    %78 = arith.addf %77, %76 : vector<2x32xf32>
    %79 = arith.divf %77, %78 : vector<2x32xf32>
    %80 = vector.extract_strided_slice %73 {offsets = [0, 32], sizes = [2, 32], strides = [1, 1]} : vector<2x128xf32> to vector<2x32xf32>
    %81 = arith.negf %80 : vector<2x32xf32>
    %82 = math.exp %81 : vector<2x32xf32>
    %cst_19 = arith.constant 1.000000e+00 : f32
    %83 = vector.broadcast %cst_19 : f32 to vector<2x32xf32>
    %84 = arith.addf %83, %82 : vector<2x32xf32>
    %85 = arith.divf %83, %84 : vector<2x32xf32>
    %86 = vector.extract_strided_slice %73 {offsets = [0, 64], sizes = [2, 32], strides = [1, 1]} : vector<2x128xf32> to vector<2x32xf32>
    %87 = math.tanh %86 : vector<2x32xf32>
    %88 = vector.extract_strided_slice %73 {offsets = [0, 96], sizes = [2, 32], strides = [1, 1]} : vector<2x128xf32> to vector<2x32xf32>
    %89 = arith.negf %88 : vector<2x32xf32>
    %90 = math.exp %89 : vector<2x32xf32>
    %cst_20 = arith.constant 1.000000e+00 : f32
    %91 = vector.broadcast %cst_20 : f32 to vector<2x32xf32>
    %92 = arith.addf %91, %90 : vector<2x32xf32>
    %93 = arith.divf %91, %92 : vector<2x32xf32>
    %94 = arith.mulf %85, %66 : vector<2x32xf32>
    %95 = arith.mulf %79, %87 : vector<2x32xf32>
    %96 = arith.addf %94, %95 : vector<2x32xf32>
    %97 = math.tanh %96 : vector<2x32xf32>
    %98 = arith.mulf %93, %97 : vector<2x32xf32>
    %99 = vector.extract_strided_slice %5 {offsets = [3, 0], sizes = [1, 128], strides = [1, 1]} : vector<16x128xf32> to vector<1x128xf32>
    %100 = vector.extract_strided_slice %5 {offsets = [11, 0], sizes = [1, 128], strides = [1, 1]} : vector<16x128xf32> to vector<1x128xf32>
    %101 = tpu.concatenate %99, %100 in 0 : vector<1x128xf32>, vector<1x128xf32> -> vector<2x128xf32>
    %cst_21 = arith.constant dense<0.000000e+00> : vector<2x128xf32>
    %102 = tpu.matmul %98, %6, %cst_21 {dimension_numbers = #tpu.dot_dimension_numbers<[1], [0], [0], [1], [0, 0, 1, 1], [], []>} : vector<2x32xf32>, vector<32x128xf32>, vector<2x128xf32> -> vector<2x128xf32>
    %103 = arith.addf %101, %102 : vector<2x128xf32>
    %104 = vector.extract_strided_slice %103 {offsets = [0, 0], sizes = [2, 32], strides = [1, 1]} : vector<2x128xf32> to vector<2x32xf32>
    %105 = arith.negf %104 : vector<2x32xf32>
    %106 = math.exp %105 : vector<2x32xf32>
    %cst_22 = arith.constant 1.000000e+00 : f32
    %107 = vector.broadcast %cst_22 : f32 to vector<2x32xf32>
    %108 = arith.addf %107, %106 : vector<2x32xf32>
    %109 = arith.divf %107, %108 : vector<2x32xf32>
    %110 = vector.extract_strided_slice %103 {offsets = [0, 32], sizes = [2, 32], strides = [1, 1]} : vector<2x128xf32> to vector<2x32xf32>
    %111 = arith.negf %110 : vector<2x32xf32>
    %112 = math.exp %111 : vector<2x32xf32>
    %cst_23 = arith.constant 1.000000e+00 : f32
    %113 = vector.broadcast %cst_23 : f32 to vector<2x32xf32>
    %114 = arith.addf %113, %112 : vector<2x32xf32>
    %115 = arith.divf %113, %114 : vector<2x32xf32>
    %116 = vector.extract_strided_slice %103 {offsets = [0, 64], sizes = [2, 32], strides = [1, 1]} : vector<2x128xf32> to vector<2x32xf32>
    %117 = math.tanh %116 : vector<2x32xf32>
    %118 = vector.extract_strided_slice %103 {offsets = [0, 96], sizes = [2, 32], strides = [1, 1]} : vector<2x128xf32> to vector<2x32xf32>
    %119 = arith.negf %118 : vector<2x32xf32>
    %120 = math.exp %119 : vector<2x32xf32>
    %cst_24 = arith.constant 1.000000e+00 : f32
    %121 = vector.broadcast %cst_24 : f32 to vector<2x32xf32>
    %122 = arith.addf %121, %120 : vector<2x32xf32>
    %123 = arith.divf %121, %122 : vector<2x32xf32>
    %124 = arith.mulf %115, %96 : vector<2x32xf32>
    %125 = arith.mulf %109, %117 : vector<2x32xf32>
    %126 = arith.addf %124, %125 : vector<2x32xf32>
    %127 = math.tanh %126 : vector<2x32xf32>
    %128 = arith.mulf %123, %127 : vector<2x32xf32>
    %129 = vector.extract_strided_slice %5 {offsets = [4, 0], sizes = [1, 128], strides = [1, 1]} : vector<16x128xf32> to vector<1x128xf32>
    %130 = vector.extract_strided_slice %5 {offsets = [12, 0], sizes = [1, 128], strides = [1, 1]} : vector<16x128xf32> to vector<1x128xf32>
    %131 = tpu.concatenate %129, %130 in 0 : vector<1x128xf32>, vector<1x128xf32> -> vector<2x128xf32>
    %cst_25 = arith.constant dense<0.000000e+00> : vector<2x128xf32>
    %132 = tpu.matmul %128, %6, %cst_25 {dimension_numbers = #tpu.dot_dimension_numbers<[1], [0], [0], [1], [0, 0, 1, 1], [], []>} : vector<2x32xf32>, vector<32x128xf32>, vector<2x128xf32> -> vector<2x128xf32>
    %133 = arith.addf %131, %132 : vector<2x128xf32>
    %134 = vector.extract_strided_slice %133 {offsets = [0, 0], sizes = [2, 32], strides = [1, 1]} : vector<2x128xf32> to vector<2x32xf32>
    %135 = arith.negf %134 : vector<2x32xf32>
    %136 = math.exp %135 : vector<2x32xf32>
    %cst_26 = arith.constant 1.000000e+00 : f32
    %137 = vector.broadcast %cst_26 : f32 to vector<2x32xf32>
    %138 = arith.addf %137, %136 : vector<2x32xf32>
    %139 = arith.divf %137, %138 : vector<2x32xf32>
    %140 = vector.extract_strided_slice %133 {offsets = [0, 32], sizes = [2, 32], strides = [1, 1]} : vector<2x128xf32> to vector<2x32xf32>
    %141 = arith.negf %140 : vector<2x32xf32>
    %142 = math.exp %141 : vector<2x32xf32>
    %cst_27 = arith.constant 1.000000e+00 : f32
    %143 = vector.broadcast %cst_27 : f32 to vector<2x32xf32>
    %144 = arith.addf %143, %142 : vector<2x32xf32>
    %145 = arith.divf %143, %144 : vector<2x32xf32>
    %146 = vector.extract_strided_slice %133 {offsets = [0, 64], sizes = [2, 32], strides = [1, 1]} : vector<2x128xf32> to vector<2x32xf32>
    %147 = math.tanh %146 : vector<2x32xf32>
    %148 = vector.extract_strided_slice %133 {offsets = [0, 96], sizes = [2, 32], strides = [1, 1]} : vector<2x128xf32> to vector<2x32xf32>
    %149 = arith.negf %148 : vector<2x32xf32>
    %150 = math.exp %149 : vector<2x32xf32>
    %cst_28 = arith.constant 1.000000e+00 : f32
    %151 = vector.broadcast %cst_28 : f32 to vector<2x32xf32>
    %152 = arith.addf %151, %150 : vector<2x32xf32>
    %153 = arith.divf %151, %152 : vector<2x32xf32>
    %154 = arith.mulf %145, %126 : vector<2x32xf32>
    %155 = arith.mulf %139, %147 : vector<2x32xf32>
    %156 = arith.addf %154, %155 : vector<2x32xf32>
    %157 = math.tanh %156 : vector<2x32xf32>
    %158 = arith.mulf %153, %157 : vector<2x32xf32>
    %159 = vector.extract_strided_slice %5 {offsets = [5, 0], sizes = [1, 128], strides = [1, 1]} : vector<16x128xf32> to vector<1x128xf32>
    %160 = vector.extract_strided_slice %5 {offsets = [13, 0], sizes = [1, 128], strides = [1, 1]} : vector<16x128xf32> to vector<1x128xf32>
    %161 = tpu.concatenate %159, %160 in 0 : vector<1x128xf32>, vector<1x128xf32> -> vector<2x128xf32>
    %cst_29 = arith.constant dense<0.000000e+00> : vector<2x128xf32>
    %162 = tpu.matmul %158, %6, %cst_29 {dimension_numbers = #tpu.dot_dimension_numbers<[1], [0], [0], [1], [0, 0, 1, 1], [], []>} : vector<2x32xf32>, vector<32x128xf32>, vector<2x128xf32> -> vector<2x128xf32>
    %163 = arith.addf %161, %162 : vector<2x128xf32>
    %164 = vector.extract_strided_slice %163 {offsets = [0, 0], sizes = [2, 32], strides = [1, 1]} : vector<2x128xf32> to vector<2x32xf32>
    %165 = arith.negf %164 : vector<2x32xf32>
    %166 = math.exp %165 : vector<2x32xf32>
    %cst_30 = arith.constant 1.000000e+00 : f32
    %167 = vector.broadcast %cst_30 : f32 to vector<2x32xf32>
    %168 = arith.addf %167, %166 : vector<2x32xf32>
    %169 = arith.divf %167, %168 : vector<2x32xf32>
    %170 = vector.extract_strided_slice %163 {offsets = [0, 32], sizes = [2, 32], strides = [1, 1]} : vector<2x128xf32> to vector<2x32xf32>
    %171 = arith.negf %170 : vector<2x32xf32>
    %172 = math.exp %171 : vector<2x32xf32>
    %cst_31 = arith.constant 1.000000e+00 : f32
    %173 = vector.broadcast %cst_31 : f32 to vector<2x32xf32>
    %174 = arith.addf %173, %172 : vector<2x32xf32>
    %175 = arith.divf %173, %174 : vector<2x32xf32>
    %176 = vector.extract_strided_slice %163 {offsets = [0, 64], sizes = [2, 32], strides = [1, 1]} : vector<2x128xf32> to vector<2x32xf32>
    %177 = math.tanh %176 : vector<2x32xf32>
    %178 = vector.extract_strided_slice %163 {offsets = [0, 96], sizes = [2, 32], strides = [1, 1]} : vector<2x128xf32> to vector<2x32xf32>
    %179 = arith.negf %178 : vector<2x32xf32>
    %180 = math.exp %179 : vector<2x32xf32>
    %cst_32 = arith.constant 1.000000e+00 : f32
    %181 = vector.broadcast %cst_32 : f32 to vector<2x32xf32>
    %182 = arith.addf %181, %180 : vector<2x32xf32>
    %183 = arith.divf %181, %182 : vector<2x32xf32>
    %184 = arith.mulf %175, %156 : vector<2x32xf32>
    %185 = arith.mulf %169, %177 : vector<2x32xf32>
    %186 = arith.addf %184, %185 : vector<2x32xf32>
    %187 = math.tanh %186 : vector<2x32xf32>
    %188 = arith.mulf %183, %187 : vector<2x32xf32>
    %189 = vector.extract_strided_slice %5 {offsets = [6, 0], sizes = [1, 128], strides = [1, 1]} : vector<16x128xf32> to vector<1x128xf32>
    %190 = vector.extract_strided_slice %5 {offsets = [14, 0], sizes = [1, 128], strides = [1, 1]} : vector<16x128xf32> to vector<1x128xf32>
    %191 = tpu.concatenate %189, %190 in 0 : vector<1x128xf32>, vector<1x128xf32> -> vector<2x128xf32>
    %cst_33 = arith.constant dense<0.000000e+00> : vector<2x128xf32>
    %192 = tpu.matmul %188, %6, %cst_33 {dimension_numbers = #tpu.dot_dimension_numbers<[1], [0], [0], [1], [0, 0, 1, 1], [], []>} : vector<2x32xf32>, vector<32x128xf32>, vector<2x128xf32> -> vector<2x128xf32>
    %193 = arith.addf %191, %192 : vector<2x128xf32>
    %194 = vector.extract_strided_slice %193 {offsets = [0, 0], sizes = [2, 32], strides = [1, 1]} : vector<2x128xf32> to vector<2x32xf32>
    %195 = arith.negf %194 : vector<2x32xf32>
    %196 = math.exp %195 : vector<2x32xf32>
    %cst_34 = arith.constant 1.000000e+00 : f32
    %197 = vector.broadcast %cst_34 : f32 to vector<2x32xf32>
    %198 = arith.addf %197, %196 : vector<2x32xf32>
    %199 = arith.divf %197, %198 : vector<2x32xf32>
    %200 = vector.extract_strided_slice %193 {offsets = [0, 32], sizes = [2, 32], strides = [1, 1]} : vector<2x128xf32> to vector<2x32xf32>
    %201 = arith.negf %200 : vector<2x32xf32>
    %202 = math.exp %201 : vector<2x32xf32>
    %cst_35 = arith.constant 1.000000e+00 : f32
    %203 = vector.broadcast %cst_35 : f32 to vector<2x32xf32>
    %204 = arith.addf %203, %202 : vector<2x32xf32>
    %205 = arith.divf %203, %204 : vector<2x32xf32>
    %206 = vector.extract_strided_slice %193 {offsets = [0, 64], sizes = [2, 32], strides = [1, 1]} : vector<2x128xf32> to vector<2x32xf32>
    %207 = math.tanh %206 : vector<2x32xf32>
    %208 = vector.extract_strided_slice %193 {offsets = [0, 96], sizes = [2, 32], strides = [1, 1]} : vector<2x128xf32> to vector<2x32xf32>
    %209 = arith.negf %208 : vector<2x32xf32>
    %210 = math.exp %209 : vector<2x32xf32>
    %cst_36 = arith.constant 1.000000e+00 : f32
    %211 = vector.broadcast %cst_36 : f32 to vector<2x32xf32>
    %212 = arith.addf %211, %210 : vector<2x32xf32>
    %213 = arith.divf %211, %212 : vector<2x32xf32>
    %214 = arith.mulf %205, %186 : vector<2x32xf32>
    %215 = arith.mulf %199, %207 : vector<2x32xf32>
    %216 = arith.addf %214, %215 : vector<2x32xf32>
    %217 = math.tanh %216 : vector<2x32xf32>
    %218 = arith.mulf %213, %217 : vector<2x32xf32>
    %219 = vector.extract_strided_slice %5 {offsets = [7, 0], sizes = [1, 128], strides = [1, 1]} : vector<16x128xf32> to vector<1x128xf32>
    %220 = vector.extract_strided_slice %5 {offsets = [15, 0], sizes = [1, 128], strides = [1, 1]} : vector<16x128xf32> to vector<1x128xf32>
    %221 = tpu.concatenate %219, %220 in 0 : vector<1x128xf32>, vector<1x128xf32> -> vector<2x128xf32>
    %cst_37 = arith.constant dense<0.000000e+00> : vector<2x128xf32>
    %222 = tpu.matmul %218, %6, %cst_37 {dimension_numbers = #tpu.dot_dimension_numbers<[1], [0], [0], [1], [0, 0, 1, 1], [], []>} : vector<2x32xf32>, vector<32x128xf32>, vector<2x128xf32> -> vector<2x128xf32>
    %223 = arith.addf %221, %222 : vector<2x128xf32>
    %224 = vector.extract_strided_slice %223 {offsets = [0, 0], sizes = [2, 32], strides = [1, 1]} : vector<2x128xf32> to vector<2x32xf32>
    %225 = arith.negf %224 : vector<2x32xf32>
    %226 = math.exp %225 : vector<2x32xf32>
    %cst_38 = arith.constant 1.000000e+00 : f32
    %227 = vector.broadcast %cst_38 : f32 to vector<2x32xf32>
    %228 = arith.addf %227, %226 : vector<2x32xf32>
    %229 = arith.divf %227, %228 : vector<2x32xf32>
    %230 = vector.extract_strided_slice %223 {offsets = [0, 32], sizes = [2, 32], strides = [1, 1]} : vector<2x128xf32> to vector<2x32xf32>
    %231 = arith.negf %230 : vector<2x32xf32>
    %232 = math.exp %231 : vector<2x32xf32>
    %cst_39 = arith.constant 1.000000e+00 : f32
    %233 = vector.broadcast %cst_39 : f32 to vector<2x32xf32>
    %234 = arith.addf %233, %232 : vector<2x32xf32>
    %235 = arith.divf %233, %234 : vector<2x32xf32>
    %236 = vector.extract_strided_slice %223 {offsets = [0, 64], sizes = [2, 32], strides = [1, 1]} : vector<2x128xf32> to vector<2x32xf32>
    %237 = math.tanh %236 : vector<2x32xf32>
    %238 = vector.extract_strided_slice %223 {offsets = [0, 96], sizes = [2, 32], strides = [1, 1]} : vector<2x128xf32> to vector<2x32xf32>
    %239 = arith.negf %238 : vector<2x32xf32>
    %240 = math.exp %239 : vector<2x32xf32>
    %cst_40 = arith.constant 1.000000e+00 : f32
    %241 = vector.broadcast %cst_40 : f32 to vector<2x32xf32>
    %242 = arith.addf %241, %240 : vector<2x32xf32>
    %243 = arith.divf %241, %242 : vector<2x32xf32>
    %244 = arith.mulf %235, %216 : vector<2x32xf32>
    %245 = arith.mulf %229, %237 : vector<2x32xf32>
    %246 = arith.addf %244, %245 : vector<2x32xf32>
    %247 = math.tanh %246 : vector<2x32xf32>
    %248 = arith.mulf %243, %247 : vector<2x32xf32>
    %249 = vector.extract_strided_slice %38 {offsets = [0, 0], sizes = [1, 32], strides = [1, 1]} : vector<2x32xf32> to vector<1x32xf32>
    %250 = vector.extract_strided_slice %68 {offsets = [0, 0], sizes = [1, 32], strides = [1, 1]} : vector<2x32xf32> to vector<1x32xf32>
    %251 = vector.extract_strided_slice %98 {offsets = [0, 0], sizes = [1, 32], strides = [1, 1]} : vector<2x32xf32> to vector<1x32xf32>
    %252 = vector.extract_strided_slice %128 {offsets = [0, 0], sizes = [1, 32], strides = [1, 1]} : vector<2x32xf32> to vector<1x32xf32>
    %253 = vector.extract_strided_slice %158 {offsets = [0, 0], sizes = [1, 32], strides = [1, 1]} : vector<2x32xf32> to vector<1x32xf32>
    %254 = vector.extract_strided_slice %188 {offsets = [0, 0], sizes = [1, 32], strides = [1, 1]} : vector<2x32xf32> to vector<1x32xf32>
    %255 = vector.extract_strided_slice %218 {offsets = [0, 0], sizes = [1, 32], strides = [1, 1]} : vector<2x32xf32> to vector<1x32xf32>
    %256 = vector.extract_strided_slice %248 {offsets = [0, 0], sizes = [1, 32], strides = [1, 1]} : vector<2x32xf32> to vector<1x32xf32>
    %257 = vector.extract_strided_slice %38 {offsets = [1, 0], sizes = [1, 32], strides = [1, 1]} : vector<2x32xf32> to vector<1x32xf32>
    %258 = vector.extract_strided_slice %68 {offsets = [1, 0], sizes = [1, 32], strides = [1, 1]} : vector<2x32xf32> to vector<1x32xf32>
    %259 = vector.extract_strided_slice %98 {offsets = [1, 0], sizes = [1, 32], strides = [1, 1]} : vector<2x32xf32> to vector<1x32xf32>
    %260 = vector.extract_strided_slice %128 {offsets = [1, 0], sizes = [1, 32], strides = [1, 1]} : vector<2x32xf32> to vector<1x32xf32>
    %261 = vector.extract_strided_slice %158 {offsets = [1, 0], sizes = [1, 32], strides = [1, 1]} : vector<2x32xf32> to vector<1x32xf32>
    %262 = vector.extract_strided_slice %188 {offsets = [1, 0], sizes = [1, 32], strides = [1, 1]} : vector<2x32xf32> to vector<1x32xf32>
    %263 = vector.extract_strided_slice %218 {offsets = [1, 0], sizes = [1, 32], strides = [1, 1]} : vector<2x32xf32> to vector<1x32xf32>
    %264 = vector.extract_strided_slice %248 {offsets = [1, 0], sizes = [1, 32], strides = [1, 1]} : vector<2x32xf32> to vector<1x32xf32>
    %265 = tpu.concatenate %249, %250, %251, %252, %253, %254, %255, %256, %257, %258, %259, %260, %261, %262, %263, %264 in 0 : vector<1x32xf32>, vector<1x32xf32>, vector<1x32xf32>, vector<1x32xf32>, vector<1x32xf32>, vector<1x32xf32>, vector<1x32xf32>, vector<1x32xf32>, vector<1x32xf32>, vector<1x32xf32>, vector<1x32xf32>, vector<1x32xf32>, vector<1x32xf32>, vector<1x32xf32>, vector<1x32xf32>, vector<1x32xf32> -> vector<16x32xf32>
    %c0_41 = arith.constant 0 : index
    %c0_42 = arith.constant 0 : index
    %266 = vector.load %arg4[%c0_41, %c0_42] : memref<32x4xf32, #tpu.memory_space<vmem>>, vector<32x4xf32>
    %cst_43 = arith.constant dense<0.000000e+00> : vector<16x4xf32>
    %267 = tpu.matmul %265, %266, %cst_43 {dimension_numbers = #tpu.dot_dimension_numbers<[1], [0], [0], [1], [0, 0, 1, 1], [], []>} : vector<16x32xf32>, vector<32x4xf32>, vector<16x4xf32> -> vector<16x4xf32>
    %c0_44 = arith.constant 0 : index
    %c0_45 = arith.constant 0 : index
    %268 = vector.load %arg5[%c0_44, %c0_45] : memref<1x4xf32, #tpu.memory_space<vmem>>, vector<1x4xf32>
    %269 = vector.broadcast %268 : vector<1x4xf32> to vector<16x4xf32>
    %270 = arith.addf %267, %269 : vector<16x4xf32>
    %271 = arith.negf %270 : vector<16x4xf32>
    %272 = math.exp %271 : vector<16x4xf32>
    %cst_46 = arith.constant 1.000000e+00 : f32
    %273 = vector.broadcast %cst_46 : f32 to vector<16x4xf32>
    %274 = arith.addf %273, %272 : vector<16x4xf32>
    %275 = arith.divf %273, %274 : vector<16x4xf32>
    %c0_47 = arith.constant 0 : index
    %c0_48 = arith.constant 0 : index
    %276 = vector.load %arg6[%c0_47, %c0_48] : memref<16x4xf32, #tpu.memory_space<vmem>>, vector<16x4xf32>
    tpu.vector_store %arg6[%c0_47, %c0_48], %275 {strides = array<i32>} : memref<16x4xf32, #tpu.memory_space<vmem>>, vector<16x4xf32>,
    return
  }
}

</mosaic_0001>

<bundles_post_ra>
// kernel: tpu_custom_call.1
= control target key start
LH: loop header
LB: loop body
LE: loop exit
PB: predicated region body
PF: predicated region fallthrough
CT: control target
= control target key end

     0   :  { %11 = vsyncpa [#allocation3], 0  ;;  %s1704_s0 = inlined_call_operand.hbm [shape: f32[16,16], index: 0, kind: input, shape index: {}]   ;;  %s1705_s1 = inlined_call_operand.hbm [shape: f32[16,128], index: 1, kind: input, shape index: {}]   ;;  %s1706_s2 = inlined_call_operand.vmem [shape: f32[32,128], index: 2, kind: input, shape index: {}]   ;;  %s1707_s3 = inlined_call_operand.vmem [shape: f32[1,128], index: 3, kind: input, shape index: {}]   ;;  %s1708_s4 = inlined_call_operand.vmem [shape: f32[32,4], index: 4, kind: input, shape index: {}]   ;;  %s1709_s5 = inlined_call_operand.vmem [shape: f32[1,4], index: 5, kind: input, shape index: {}]   ;;  %s1710_s6 = inlined_call_operand.vmem [shape: f32[16,4], index: 6, kind: output, shape index: {}]  }
   0x1   :  { %12 = vsyncpa [#allocation5], 0  ;;  %s1455_s21 = smov [#allocation2]  }
   0x2   :  { %s18_s22 = sshll.u32 %s1455_s21, 4  ;;  %s19_s22 = int_to_ptr.vmem [resolvable:$true] %s18_s22 }
   0x3   :  { %s1419_s23 = scalar_lea.vmem %s19_s22, 256  ;;  %p1424_p1 = scmp.lt.s32.totalorder %s19_s22, %s19_s22 }
   0x4   :  { %p1420_p0 = scmp.ne.s32.totalorder %s19_s22, %s1419_s23  ;;  %p1425_p2 = scmp.lt.s32.totalorder %s1419_s23, %s1419_s23 }
   0x6   :  { %p1426_p3 = por %p1425_p2, %p1424_p1 }
   0x8   :  { %p1427_p4 = pnand %p1426_p3, %p1420_p0 }
   0xa   :  { %1430 = shalt.err (!%p1427_p4)
}
   0xb   :  { %s1456_s24 = smov 128   ;;  %s1457_s25 = smov 8  }
   0xc   :  { %24 = dma.hbm_to_vmem [thread:$0]  %s1704_s0, 256, %s19_s22, [#allocation3], %s1456_s24, %s1456_s24, %s1457_s25  }
   0xd   :  { %s1458_s28 = smov [#allocation4]  }
   0xe   :  { %s30_s29 = sshll.u32 %s1458_s28, 4  ;;  %s31_s29 = int_to_ptr.vmem [resolvable:$true] %s30_s29 }
   0xf   :  { %s1439_s30 = scalar_lea.vmem %s31_s29, 256  ;;  %p1444_p6 = scmp.lt.s32.totalorder %s31_s29, %s31_s29 }
  0x10   :  { %p1440_p5 = scmp.ne.s32.totalorder %s31_s29, %s1439_s30  ;;  %p1445_p7 = scmp.lt.s32.totalorder %s1439_s30, %s1439_s30 }
  0x12   :  { %p1446_p8 = por %p1445_p7, %p1444_p6 }
  0x14   :  { %p1447_p9 = pnand %p1446_p8, %p1440_p5 }
  0x16   :  { %1450 = shalt.err (!%p1447_p9)
}
  0x17   :  { %36 = dma.hbm_to_vmem [thread:$0]  %s1705_s1, 256, %s31_s29, [#allocation5], %s1456_s24, %s1456_s24, %s1457_s25  }
  0x18   :  { %1451 = dma.done.wait [#allocation3], 256  }
  0x19   :  { %1452 = vsyncadd [#allocation3], 4294967040 }
  0x1a   :  { %1453 = dma.done.wait [#allocation5], 256  }
  0x1b   :  { %1454 = vsyncadd [#allocation5], 4294967040  ;;  %v1459_v0 = vmov 0.0   ;;  %vm1460_vm0 = vmmov 0   ;;  %v54_v1 = vld [vmem:[#allocation4 + $0x8] sm:$0xff]  ;;  %v53_v3 = vld [vmem:[#allocation4] sm:$0xff] }
  0x1c   :  { %1232 = vmatprep.subr.mxu1 %v1459_v0  ;;  %1240 = vmatprep.mubr.msk.f32.mxu1 %vm1460_vm0, %v1459_v0  ;;  %v1510_v2 = vld [vmem:[%s1706_s2 + $0x18] sm:$0xff]  ;;  %v1516_v4 = vld [vmem:[%s1706_s2 + $0x10] sm:$0xff]  ;;  %v51_v5 = vld [vmem:[#allocation2] sm:$0xff]  ;;  %vm62_vm1 = vcmask 130048   ;;  %vm151_vm2 = vcmask 1040384   ;;  %s1462_s16 = smov 32  }
  0x1d   :  { %1225 = vmatprep.subr.mxu0 %v54_v1  ;;  %1233 = vmatpush3.msra.mxu1 %v1510_v2  ;;  %v52_v6 = vld [vmem:[#allocation2 + $0x8] sm:$0xff]  ;;  %v1529_v8 = vld [vmem:[%s1706_s2] sm:$0xff]  ;;  %vm153_vm3 = vcmask 261120   ;;  %vm1016_vm4 = vcmask 1041408   ;;  %vm1018_vm5 = vcmask 1042432   ;;  %vm1020_vm6 = vcmask 1043456  }
  0x1e   :  { %1226 = vmatpush3.msra.mxu0 %v54_v1  ;;  %1234 = vmatprep.subr.mxu1 %v1459_v0  ;;  %v1523_v7 = vld [vmem:[%s1706_s2 + $0x8] sm:$0xff]  ;;  %v1152_v9 = vld [vmem:[%s1707_s3] ss:$0 sm:$0xff]  ;;  %s1461_s3 = smov 64   ;;  %vm1022_vm7 = vcmask 1044480   ;;  %vm1024_vm8 = vcmask 1045504  }
  0x1f   :  { %1227 = vmatprep.subr.mxu0 %v53_v3  ;;  %1235 = vmatpush3.msra.mxu1 %v1516_v4  ;;  %vm1026_vm9 = vcmask 1046528   ;;  %vm1143_vm10 = vcmask 31744  }
  0x20   :  { %1228 = vmatpush3.msra.mxu0 %v53_v3  ;;  %1229 = vmatprep.mubr.msk.f32.mxu0 %vm62_vm1, %v51_v5 }
  0x21   :  { %1236 = vmatprep.subr.mxu1 %v1459_v0  ;;  %1230 = vmatmul.mubr.msk.f32.vlgmr.msra.gmra.mxu0 %vm62_vm1, %v52_v6 }
  0x22   :  { %1237 = vmatpush3.msra.mxu1 %v1523_v7  ;;  %1243 = vmatprep.subr.mxu0 %v1459_v0 }
  0x23   :  { %1238 = vmatprep.subr.mxu1 %v1459_v0  ;;  %1244 = vmatpush3.msra.mxu0 %v1510_v2 }
  0x24   :  { %1239 = vmatpush3.msra.mxu1 %v1529_v8  ;;  %1245 = vmatprep.subr.mxu0 %v1459_v0 }
  0x25   :  { %1241 = vmatmul.mubr.f32.vlgmr.msra.gmra.mxu1 %v1459_v0  ;;  %1246 = vmatpush3.msra.mxu0 %v1516_v4 }
  0x26   :  { %1247 = vmatprep.subr.mxu0 %v1459_v0  ;;  %1251 = vmatprep.mubr.msk.f32.mxu0 %vm1460_vm0, %v1459_v0 }
  0x27   :  { %1248 = vmatpush3.msra.mxu0 %v1523_v7  ;;  %1254 = vmatprep.subr.mxu1 %v1459_v0 }
  0x28   :  { %1249 = vmatprep.subr.mxu0 %v1459_v0  ;;  %1255 = vmatpush3.msra.mxu1 %v1510_v2 }
  0x29   :  { %1250 = vmatpush3.msra.mxu0 %v1529_v8  ;;  %1256 = vmatprep.subr.mxu1 %v1459_v0 }
  0x2a   :  { %1257 = vmatpush3.msra.mxu1 %v1516_v4  ;;  %1262 = vmatprep.mubr.msk.f32.mxu1 %vm1460_vm0, %v1459_v0 }
  0x2b   :  { %1258 = vmatprep.subr.mxu1 %v1459_v0  ;;  %1265 = vmatprep.subr.mxu0 %v1459_v0 }
  0x2c   :  { %1259 = vmatpush3.msra.mxu1 %v1523_v7 }
  0x2d   :  { %1260 = vmatprep.subr.mxu1 %v1459_v0 }
  0x2e   :  { %1261 = vmatpush3.msra.mxu1 %v1529_v8 }
  0x2f   :  { %1276 = vmatprep.subr.mxu1 %v1459_v0 }
  0xe1   :  { %v1231_v10 = vpop.f32.mrf.mxu0 }
  0xe2   :  { %v141_v11 = vadd.f32 %v1231_v10, %v1152_v9 }
  0xe3   :  { %v135_v12 = vpop.f32.mrf.mxu0 }
  0xe4   :  { %v136_v13 = vadd.f32 %v1152_v9, %v135_v12  ;;  %v149_v14 = vrot.slane %v141_v11, 7  ;;  %v358_v15 = vrot.slane %v141_v11, 1  ;;  %v463_v16 = vrot.slane %v141_v11, 2 }
  0xe5   :  { %v223_v17 = vpop.f32.mrf.mxu1  ;;  %v568_v18 = vrot.slane %v141_v11, 3  ;;  %v673_v19 = vrot.slane %v141_v11, 4  ;;  %v778_v20 = vrot.slane %v141_v11, 5  ;;  %v883_v21 = vrot.slane %v141_v11, 6 }
  0xe6   :  { %v152_v22 = vsel %vm151_vm2, %v136_v13, %v149_v14  ;;  %v253_v23 = vrot.slane %v136_v13, 1  ;;  %v356_v24 = vrot.slane %v136_v13, 2  ;;  %v461_v25 = vrot.slane %v136_v13, 3 }
  0xe7   :  { %v227_v26 = vadd.f32 %v223_v17, %v152_v22  ;;  %v1242_v27 = vpop.f32.mrf.mxu1  ;;  %v566_v28 = vrot.slane %v136_v13, 4  ;;  %v671_v29 = vrot.slane %v136_v13, 5  ;;  %v776_v30 = vrot.slane %v136_v13, 6 }
  0xe8   :  { %v255_v31 = vsel %vm151_vm2, %v253_v23, %v141_v11  ;;  %v1563_v32 = vsel %vm151_vm2, %v356_v24, %v358_v15  ;;  %v1566_v33 = vsel %vm151_vm2, %v461_v25, %v463_v16  ;;  %v881_v34 = vrot.slane %v136_v13, 7 }
  0xe9   :  { %1339 = vtanh.f32 %v227_v26  ;;  %v1569_v35 = vsel %vm151_vm2, %v566_v28, %v568_v18  ;;  %v1572_v36 = vsel %vm151_vm2, %v671_v29, %v673_v19  ;;  %v1575_v37 = vsel %vm151_vm2, %v776_v30, %v778_v20 }
  0xea   :  { %v1578_v38 = vsel %vm151_vm2, %v881_v34, %v883_v21  ;;  %v1155_v40 = vmul.f32 -1.442695, %v227_v26 }
  0xec   :  { %1341 = vpow2.f32 %v1155_v40 }
  0xf6   :  { %v1340_v39 = vpop.eup %1339 }
  0xf7   :  { %237 = vrot.lane.b32.xlu0 %v1340_v39, %s1461_s3 }
  0xf9   :  { %v1342_v41 = vpop.eup %1341 }
  0xfa   :  { %v231_v42 = vadd.f32 1.0, %v1342_v41 }
  0xfc   :  { %1343 = vrcp.f32 %v231_v42 }
 0x109   :  { %v1344_v43 = vpop.eup %1343 }
 0x10a   :  { %v235_v46 = vmul.f32 0.0, %v1344_v43 }
 0x169   :  { %v238_v44 = vpop.permute.xlu0 %237 }
 0x16a   :  { %v240_v45 = vmul.f32 %v1344_v43, %v238_v44 }
 0x16c   :  { %242 = vrot.lane.b32.xlu0 %v240_v45, %s1462_s16 }
 0x1de   :  { %v243_v47 = vpop.permute.xlu0 %242 }
 0x1df   :  { %v245_v48 = vadd.f32 %v243_v47, %v235_v46 }
 0x1e1   :  { %1345 = vtanh.f32 %v245_v48 }
 0x1ee   :  { %v1346_v49 = vpop.eup %1345 }
 0x1ef   :  { %248 = vrot.lane.b32.xlu1 %v1346_v49, %s1461_s3 }
 0x261   :  { %v249_v50 = vpop.permute.xlu1 %248 }
 0x262   :  { %v1583_v51 = vmul.f32 %v1344_v43, %v249_v50 }
 0x264   :  { %257 = vrot.lane.b32.xlu1 %v1583_v51, %s1462_s16  ;;  %v1001_v28 = vrot.slane %v1583_v51, 1 }
 0x2d6   :  { %v258_v52 = vpop.permute.xlu1 %257 }
 0x2d7   :  { %1252 = vmatmul.mubr.msk.f32.vlgmr.msra.gmra.mxu0 %vm153_vm3, %v258_v52 }
 0x2d8   :  { %1266 = vmatpush3.msra.mxu0 %v1510_v2  ;;  %1273 = vmatprep.mubr.msk.f32.mxu0 %vm1460_vm0, %v1459_v0 }
 0x2d9   :  { %1267 = vmatprep.subr.mxu0 %v1459_v0 }
 0x2da   :  { %1268 = vmatpush3.msra.mxu0 %v1516_v4 }
 0x2db   :  { %1269 = vmatprep.subr.mxu0 %v1459_v0 }
 0x2dc   :  { %1270 = vmatpush3.msra.mxu0 %v1523_v7 }
 0x2dd   :  { %1271 = vmatprep.subr.mxu0 %v1459_v0 }
 0x2de   :  { %1272 = vmatpush3.msra.mxu0 %v1529_v8 }
 0x2df   :  { %1287 = vmatprep.subr.mxu0 %v1459_v0 }
 0x397   :  { %v327_v53 = vpop.f32.mrf.mxu0 }
 0x398   :  { %v331_v54 = vadd.f32 %v327_v53, %v255_v31 }
 0x399   :  { %v1253_v55 = vpop.f32.mrf.mxu0 }
 0x39a   :  { %1347 = vtanh.f32 %v331_v54  ;;  %v1157_v57 = vmul.f32 -1.442695, %v331_v54 }
 0x39c   :  { %1349 = vpow2.f32 %v1157_v57 }
 0x3a7   :  { %v1348_v56 = vpop.eup %1347 }
 0x3a8   :  { %341 = vrot.lane.b32.xlu0 %v1348_v56, %s1461_s3 }
 0x3a9   :  { %v1350_v58 = vpop.eup %1349 }
 0x3aa   :  { %v335_v59 = vadd.f32 1.0, %v1350_v58 }
 0x3ac   :  { %1351 = vrcp.f32 %v335_v59 }
 0x3b9   :  { %v1352_v60 = vpop.eup %1351 }
 0x3ba   :  { %v339_v63 = vmul.f32 %v1352_v60, %v245_v48 }
 0x41a   :  { %v342_v61 = vpop.permute.xlu0 %341 }
 0x41b   :  { %v344_v62 = vmul.f32 %v1352_v60, %v342_v61 }
 0x41d   :  { %346 = vrot.lane.b32.xlu1 %v344_v62, %s1462_s16 }
 0x48f   :  { %v347_v1 = vpop.permute.xlu1 %346 }
 0x490   :  { %v349_v3 = vadd.f32 %v347_v1, %v339_v63 }
 0x492   :  { %1353 = vtanh.f32 %v349_v3 }
 0x49f   :  { %v1354_v5 = vpop.eup %1353 }
 0x4a0   :  { %352 = vrot.lane.b32.xlu0 %v1354_v5, %s1461_s3 }
 0x512   :  { %v353_v6 = vpop.permute.xlu0 %352 }
 0x513   :  { %v355_v9 = vmul.f32 %v1352_v60, %v353_v6 }
 0x515   :  { %362 = vrot.lane.b32.xlu1 %v355_v9, %s1462_s16  ;;  %v986_v25 = vrot.slane %v355_v9, 7 }
 0x517   :  { %v1015_v31 = vsel %vm151_vm2, %v1583_v51, %v986_v25 }
 0x587   :  { %v363_v10 = vpop.permute.xlu1 %362 }
 0x588   :  { %1263 = vmatmul.mubr.msk.f32.vlgmr.msra.gmra.mxu1 %vm153_vm3, %v363_v10 }
 0x589   :  { %1277 = vmatpush3.msra.mxu1 %v1510_v2  ;;  %1284 = vmatprep.mubr.msk.f32.mxu1 %vm1460_vm0, %v1459_v0 }
 0x58a   :  { %1278 = vmatprep.subr.mxu1 %v1459_v0 }
 0x58b   :  { %1279 = vmatpush3.msra.mxu1 %v1516_v4 }
 0x58c   :  { %1280 = vmatprep.subr.mxu1 %v1459_v0 }
 0x58d   :  { %1281 = vmatpush3.msra.mxu1 %v1523_v7 }
 0x58e   :  { %1282 = vmatprep.subr.mxu1 %v1459_v0 }
 0x58f   :  { %1283 = vmatpush3.msra.mxu1 %v1529_v8 }
 0x590   :  { %1298 = vmatprep.subr.mxu1 %v1459_v0 }
 0x648   :  { %v432_v11 = vpop.f32.mrf.mxu1 }
 0x649   :  { %v436_v12 = vadd.f32 %v432_v11, %v1563_v32  ;;  %v1028_v32 = vsel %vm151_vm2, %v1001_v28, %v355_v9 }
 0x64a   :  { %v1264_v13 = vpop.f32.mrf.mxu1 }
 0x64b   :  { %1355 = vtanh.f32 %v436_v12  ;;  %v1159_v15 = vmul.f32 -1.442695, %v436_v12 }
 0x64d   :  { %1357 = vpow2.f32 %v1159_v15 }
 0x658   :  { %v1356_v14 = vpop.eup %1355 }
 0x659   :  { %446 = vrot.lane.b32.xlu0 %v1356_v14, %s1461_s3 }
 0x65a   :  { %v1358_v16 = vpop.eup %1357 }
 0x65b   :  { %v440_v17 = vadd.f32 1.0, %v1358_v16 }
 0x65d   :  { %1359 = vrcp.f32 %v440_v17 }
 0x66a   :  { %v1360_v18 = vpop.eup %1359 }
 0x66b   :  { %v444_v21 = vmul.f32 %v1360_v18, %v349_v3 }
 0x6cb   :  { %v447_v19 = vpop.permute.xlu0 %446 }
 0x6cc   :  { %v449_v20 = vmul.f32 %v1360_v18, %v447_v19 }
 0x6ce   :  { %451 = vrot.lane.b32.xlu1 %v449_v20, %s1462_s16 }
 0x740   :  { %v452_v22 = vpop.permute.xlu1 %451 }
 0x741   :  { %v454_v23 = vadd.f32 %v452_v22, %v444_v21 }
 0x743   :  { %1361 = vtanh.f32 %v454_v23 }
 0x750   :  { %v1362_v24 = vpop.eup %1361 }
 0x751   :  { %457 = vrot.lane.b32.xlu0 %v1362_v24, %s1461_s3 }
 0x7c3   :  { %v458_v26 = vpop.permute.xlu0 %457 }
 0x7c4   :  { %v460_v27 = vmul.f32 %v1360_v18, %v458_v26 }
 0x7c6   :  { %v988_v29 = vrot.slane %v460_v27, 6  ;;  %v1003_v30 = vrot.slane %v460_v27, 7  ;;  %467 = vrot.lane.b32.xlu1 %v460_v27, %s1462_s16 }
 0x7c8   :  { %v1017_v34 = vsel %vm1016_vm4, %v1015_v31, %v988_v29  ;;  %v1029_v39 = vsel %vm1016_vm4, %v1028_v32, %v1003_v30 }
 0x838   :  { %v468_v40 = vpop.permute.xlu1 %467 }
 0x839   :  { %1274 = vmatmul.mubr.msk.f32.vlgmr.msra.gmra.mxu0 %vm153_vm3, %v468_v40 }
 0x83a   :  { %1288 = vmatpush3.msra.mxu0 %v1510_v2  ;;  %1295 = vmatprep.mubr.msk.f32.mxu0 %vm1460_vm0, %v1459_v0 }
 0x83b   :  { %1289 = vmatprep.subr.mxu0 %v1459_v0 }
 0x83c   :  { %1290 = vmatpush3.msra.mxu0 %v1516_v4 }
 0x83d   :  { %1291 = vmatprep.subr.mxu0 %v1459_v0 }
 0x83e   :  { %1292 = vmatpush3.msra.mxu0 %v1523_v7 }
 0x83f   :  { %1293 = vmatprep.subr.mxu0 %v1459_v0 }
 0x840   :  { %1294 = vmatpush3.msra.mxu0 %v1529_v8 }
 0x841   :  { %1309 = vmatprep.subr.mxu0 %v1459_v0 }
 0x8f9   :  { %v537_v41 = vpop.f32.mrf.mxu0 }
 0x8fa   :  { %v541_v42 = vadd.f32 %v537_v41, %v1566_v33 }
 0x8fb   :  { %v1275_v43 = vpop.f32.mrf.mxu0 }
 0x8fc   :  { %1363 = vtanh.f32 %v541_v42  ;;  %v1161_v45 = vmul.f32 -1.442695, %v541_v42 }
 0x8fe   :  { %1365 = vpow2.f32 %v1161_v45 }
 0x909   :  { %v1364_v44 = vpop.eup %1363 }
 0x90a   :  { %551 = vrot.lane.b32.xlu0 %v1364_v44, %s1461_s3 }
 0x90b   :  { %v1366_v46 = vpop.eup %1365 }
 0x90c   :  { %v545_v47 = vadd.f32 1.0, %v1366_v46 }
 0x90e   :  { %1367 = vrcp.f32 %v545_v47 }
 0x91b   :  { %v1368_v48 = vpop.eup %1367 }
 0x91c   :  { %v549_v51 = vmul.f32 %v1368_v48, %v454_v23 }
 0x97c   :  { %v552_v49 = vpop.permute.xlu0 %551 }
 0x97d   :  { %v554_v50 = vmul.f32 %v1368_v48, %v552_v49 }
 0x97f   :  { %556 = vrot.lane.b32.xlu1 %v554_v50, %s1462_s16 }
 0x9f1   :  { %v557_v52 = vpop.permute.xlu1 %556 }
 0x9f2   :  { %v559_v53 = vadd.f32 %v557_v52, %v549_v51 }
 0x9f4   :  { %1369 = vtanh.f32 %v559_v53 }
 0xa01   :  { %v1370_v33 = vpop.eup %1369 }
 0xa02   :  { %562 = vrot.lane.b32.xlu0 %v1370_v33, %s1461_s3 }
 0xa74   :  { %v563_v54 = vpop.permute.xlu0 %562 }
 0xa75   :  { %v565_v55 = vmul.f32 %v1368_v48, %v563_v54 }
 0xa77   :  { %v990_v56 = vrot.slane %v565_v55, 5  ;;  %v1005_v57 = vrot.slane %v565_v55, 6  ;;  %572 = vrot.lane.b32.xlu1 %v565_v55, %s1462_s16 }
 0xa79   :  { %v1019_v58 = vsel %vm1018_vm5, %v1017_v34, %v990_v56  ;;  %v1030_v59 = vsel %vm1018_vm5, %v1029_v39, %v1005_v57 }
 0xae9   :  { %v573_v60 = vpop.permute.xlu1 %572 }
 0xaea   :  { %1285 = vmatmul.mubr.msk.f32.vlgmr.msra.gmra.mxu1 %vm153_vm3, %v573_v60 }
 0xaeb   :  { %1299 = vmatpush3.msra.mxu1 %v1510_v2  ;;  %1306 = vmatprep.mubr.msk.f32.mxu1 %vm1460_vm0, %v1459_v0 }
 0xaec   :  { %1300 = vmatprep.subr.mxu1 %v1459_v0 }
 0xaed   :  { %1301 = vmatpush3.msra.mxu1 %v1516_v4 }
 0xaee   :  { %1302 = vmatprep.subr.mxu1 %v1459_v0 }
 0xaef   :  { %1303 = vmatpush3.msra.mxu1 %v1523_v7 }
 0xaf0   :  { %1304 = vmatprep.subr.mxu1 %v1459_v0 }
 0xaf1   :  { %1305 = vmatpush3.msra.mxu1 %v1529_v8 }
 0xbaa   :  { %v642_v61 = vpop.f32.mrf.mxu1 }
 0xbab   :  { %v646_v62 = vadd.f32 %v642_v61, %v1569_v35 }
 0xbac   :  { %v1286_v63 = vpop.f32.mrf.mxu1 }
 0xbad   :  { %1371 = vtanh.f32 %v646_v62  ;;  %v1163_v3 = vmul.f32 -1.442695, %v646_v62 }
 0xbaf   :  { %1373 = vpow2.f32 %v1163_v3 }
 0xbba   :  { %v1372_v1 = vpop.eup %1371 }
 0xbbb   :  { %656 = vrot.lane.b32.xlu0 %v1372_v1, %s1461_s3 }
 0xbbc   :  { %v1374_v5 = vpop.eup %1373 }
 0xbbd   :  { %v650_v6 = vadd.f32 1.0, %v1374_v5 }
 0xbbf   :  { %1375 = vrcp.f32 %v650_v6 }
 0xbcc   :  { %v1376_v9 = vpop.eup %1375 }
 0xbcd   :  { %v654_v12 = vmul.f32 %v1376_v9, %v559_v53 }
 0xc2d   :  { %v657_v10 = vpop.permute.xlu0 %656 }
 0xc2e   :  { %v659_v11 = vmul.f32 %v1376_v9, %v657_v10 }
 0xc30   :  { %661 = vrot.lane.b32.xlu1 %v659_v11, %s1462_s16 }
 0xca2   :  { %v662_v13 = vpop.permute.xlu1 %661 }
 0xca3   :  { %v664_v14 = vadd.f32 %v662_v13, %v654_v12 }
 0xca5   :  { %1377 = vtanh.f32 %v664_v14 }
 0xcb2   :  { %v1378_v35 = vpop.eup %1377 }
 0xcb3   :  { %667 = vrot.lane.b32.xlu0 %v1378_v35, %s1461_s3  ;;  %v1037_v35 = vld [vmem:[%s1708_s4 + $0x10] sm:$0xff] }
 0xd25   :  { %v668_v15 = vpop.permute.xlu0 %667 }
 0xd26   :  { %v670_v16 = vmul.f32 %v1376_v9, %v668_v15  ;;  %v1036_v15 = vld [vmem:[%s1708_s4 + $0x8] sm:$0xff] }
 0xd28   :  { %v992_v17 = vrot.slane %v670_v16, 4  ;;  %v1007_v18 = vrot.slane %v670_v16, 5  ;;  %677 = vrot.lane.b32.xlu1 %v670_v16, %s1462_s16  ;;  %v1035_v16 = vld [vmem:[%s1708_s4] sm:$0xff] }
 0xd2a   :  { %v1021_v19 = vsel %vm1020_vm6, %v1019_v58, %v992_v17  ;;  %v1031_v20 = vsel %vm1020_vm6, %v1030_v59, %v1007_v18 }
 0xd9a   :  { %v678_v21 = vpop.permute.xlu1 %677 }
 0xd9b   :  { %1296 = vmatmul.mubr.msk.f32.vlgmr.msra.gmra.mxu0 %vm153_vm3, %v678_v21 }
 0xd9c   :  { %1310 = vmatpush3.msra.mxu0 %v1510_v2  ;;  %1317 = vmatprep.mubr.msk.f32.mxu0 %vm1460_vm0, %v1459_v0 }
 0xd9d   :  { %1311 = vmatprep.subr.mxu0 %v1459_v0 }
 0xd9e   :  { %1312 = vmatpush3.msra.mxu0 %v1516_v4 }
 0xd9f   :  { %1313 = vmatprep.subr.mxu0 %v1459_v0 }
 0xda0   :  { %1314 = vmatpush3.msra.mxu0 %v1523_v7 }
 0xda1   :  { %1315 = vmatprep.subr.mxu0 %v1459_v0 }
 0xda2   :  { %1316 = vmatpush3.msra.mxu0 %v1529_v8 }
 0xe5b   :  { %v747_v22 = vpop.f32.mrf.mxu0 }
 0xe5c   :  { %v751_v23 = vadd.f32 %v747_v22, %v1572_v36 }
 0xe5d   :  { %v1297_v24 = vpop.f32.mrf.mxu0 }
 0xe5e   :  { %1379 = vtanh.f32 %v751_v23  ;;  %v1165_v25 = vmul.f32 -1.442695, %v751_v23 }
 0xe60   :  { %1381 = vpow2.f32 %v1165_v25  ;;  %v1170_v25 = vld [vmem:[%s1709_s5] ss:$0 sm:$0xff] }
 0xe6b   :  { %v1380_v2 = vpop.eup %1379 }
 0xe6c   :  { %761 = vrot.lane.b32.xlu0 %v1380_v2, %s1461_s3 }
 0xe6d   :  { %v1382_v26 = vpop.eup %1381 }
 0xe6e   :  { %v755_v4 = vadd.f32 1.0, %v1382_v26 }
 0xe70   :  { %1383 = vrcp.f32 %v755_v4 }
 0xe7d   :  { %v1384_v27 = vpop.eup %1383 }
 0xe7e   :  { %v759_v0 = vmul.f32 %v1384_v27, %v664_v14 }
 0xede   :  { %v762_v28 = vpop.permute.xlu0 %761 }
 0xedf   :  { %v764_v7 = vmul.f32 %v1384_v27, %v762_v28 }
 0xee1   :  { %766 = vrot.lane.b32.xlu1 %v764_v7, %s1462_s16 }
 0xf53   :  { %v767_v8 = vpop.permute.xlu1 %766 }
 0xf54   :  { %v769_v29 = vadd.f32 %v767_v8, %v759_v0 }
 0xf56   :  { %1385 = vtanh.f32 %v769_v29 }
 0xf63   :  { %v1386_v36 = vpop.eup %1385 }
 0xf64   :  { %772 = vrot.lane.b32.xlu0 %v1386_v36, %s1461_s3 }
 0xfd6   :  { %v773_v30 = vpop.permute.xlu0 %772 }
 0xfd7   :  { %v775_v31 = vmul.f32 %v1384_v27, %v773_v30 }
 0xfd9   :  { %v994_v32 = vrot.slane %v775_v31, 3  ;;  %v1009_v34 = vrot.slane %v775_v31, 4  ;;  %782 = vrot.lane.b32.xlu1 %v775_v31, %s1462_s16 }
 0xfdb   :  { %v1023_v39 = vsel %vm1022_vm7, %v1021_v19, %v994_v32  ;;  %v1032_v40 = vsel %vm1022_vm7, %v1031_v20, %v1009_v34 }
0x104b   :  { %v783_v41 = vpop.permute.xlu1 %782 }
0x104c   :  { %1307 = vmatmul.mubr.msk.f32.vlgmr.msra.gmra.mxu1 %vm153_vm3, %v783_v41 }
0x110c   :  { %v852_v42 = vpop.f32.mrf.mxu1 }
0x110d   :  { %v856_v43 = vadd.f32 %v852_v42, %v1575_v37 }
0x110e   :  { %v1308_v44 = vpop.f32.mrf.mxu1 }
0x110f   :  { %1387 = vtanh.f32 %v856_v43  ;;  %v1167_v46 = vmul.f32 -1.442695, %v856_v43 }
0x1111   :  { %1389 = vpow2.f32 %v1167_v46 }
0x111c   :  { %v1388_v45 = vpop.eup %1387 }
0x111d   :  { %866 = vrot.lane.b32.xlu0 %v1388_v45, %s1461_s3 }
0x111e   :  { %v1390_v47 = vpop.eup %1389 }
0x111f   :  { %v860_v48 = vadd.f32 1.0, %v1390_v47 }
0x1121   :  { %1391 = vrcp.f32 %v860_v48 }
0x112e   :  { %v1392_v49 = vpop.eup %1391 }
0x112f   :  { %v864_v52 = vmul.f32 %v1392_v49, %v769_v29 }
0x118f   :  { %v867_v50 = vpop.permute.xlu0 %866 }
0x1190   :  { %v869_v51 = vmul.f32 %v1392_v49, %v867_v50 }
0x1192   :  { %871 = vrot.lane.b32.xlu1 %v869_v51, %s1462_s16 }
0x1204   :  { %v872_v53 = vpop.permute.xlu1 %871 }
0x1205   :  { %v874_v33 = vadd.f32 %v872_v53, %v864_v52 }
0x1207   :  { %1393 = vtanh.f32 %v874_v33 }
0x1214   :  { %v1394_v37 = vpop.eup %1393 }
0x1215   :  { %877 = vrot.lane.b32.xlu0 %v1394_v37, %s1461_s3 }
0x1287   :  { %v878_v54 = vpop.permute.xlu0 %877 }
0x1288   :  { %v880_v55 = vmul.f32 %v1392_v49, %v878_v54 }
0x128a   :  { %v996_v56 = vrot.slane %v880_v55, 2  ;;  %v1011_v57 = vrot.slane %v880_v55, 3  ;;  %887 = vrot.lane.b32.xlu1 %v880_v55, %s1462_s16 }
0x128c   :  { %v1025_v58 = vsel %vm1024_vm8, %v1023_v39, %v996_v56  ;;  %v1033_v59 = vsel %vm1024_vm8, %v1032_v40, %v1011_v57 }
0x12fc   :  { %v888_v60 = vpop.permute.xlu1 %887 }
0x12fd   :  { %1318 = vmatmul.mubr.msk.f32.vlgmr.msra.gmra.mxu0 %vm153_vm3, %v888_v60 }
0x13bd   :  { %v957_v61 = vpop.f32.mrf.mxu0 }
0x13be   :  { %v961_v62 = vadd.f32 %v957_v61, %v1578_v38  ;;  %v1038_v38 = vld [vmem:[%s1708_s4 + $0x18] sm:$0xff] }
0x13bf   :  { %v1319_v63 = vpop.f32.mrf.mxu0  ;;  %1320 = vmatprep.subr.mxu1 %v1038_v38 }
0x13c0   :  { %1395 = vtanh.f32 %v961_v62  ;;  %v1169_v3 = vmul.f32 -1.442695, %v961_v62  ;;  %1321 = vmatpush3.msra.mxu1 %v1038_v38 }
0x13c1   :  { %1322 = vmatprep.subr.mxu1 %v1037_v35 }
0x13c2   :  { %1397 = vpow2.f32 %v1169_v3  ;;  %1323 = vmatpush3.msra.mxu1 %v1037_v35 }
0x13c3   :  { %1324 = vmatprep.subr.mxu1 %v1036_v15 }
0x13c4   :  { %1325 = vmatpush3.msra.mxu1 %v1036_v15 }
0x13c5   :  { %1326 = vmatprep.subr.mxu1 %v1035_v16 }
0x13c6   :  { %1327 = vmatpush3.msra.mxu1 %v1035_v16 }
0x13cd   :  { %v1396_v1 = vpop.eup %1395 }
0x13ce   :  { %971 = vrot.lane.b32.xlu0 %v1396_v1, %s1461_s3 }
0x13cf   :  { %v1398_v5 = vpop.eup %1397 }
0x13d0   :  { %v965_v6 = vadd.f32 1.0, %v1398_v5 }
0x13d2   :  { %1399 = vrcp.f32 %v965_v6 }
0x13df   :  { %v1400_v9 = vpop.eup %1399 }
0x13e0   :  { %v969_v12 = vmul.f32 %v1400_v9, %v874_v33 }
0x1440   :  { %v972_v10 = vpop.permute.xlu0 %971 }
0x1441   :  { %v974_v11 = vmul.f32 %v1400_v9, %v972_v10 }
0x1443   :  { %976 = vrot.lane.b32.xlu1 %v974_v11, %s1462_s16 }
0x14b5   :  { %v977_v13 = vpop.permute.xlu1 %976 }
0x14b6   :  { %v979_v14 = vadd.f32 %v977_v13, %v969_v12 }
0x14b8   :  { %1401 = vtanh.f32 %v979_v14 }
0x14c5   :  { %v1402_v17 = vpop.eup %1401 }
0x14c6   :  { %982 = vrot.lane.b32.xlu0 %v1402_v17, %s1461_s3 }
0x1538   :  { %v983_v18 = vpop.permute.xlu0 %982 }
0x1539   :  { %v985_v19 = vmul.f32 %v1400_v9, %v983_v18 }
0x153b   :  { %v999_v20 = vrot.slane %v985_v19, 1  ;;  %v1013_v21 = vrot.slane %v985_v19, 2 }
0x153d   :  { %v1027_v22 = vsel %vm1026_vm9, %v1025_v58, %v999_v20  ;;  %v1034_v23 = vsel %vm1026_vm9, %v1033_v59, %v1013_v21 }
0x153e   :  { %1048 = vrot.lane.b32.xlu1 %v1027_v22, %s1462_s16  ;;  %1050 = vrot.lane.b32.xlu0 %v1034_v23, %s1462_s16 }
0x15b0   :  { %v1049_v24 = vpop.permute.xlu1 %1048  ;;  %v1051_v2 = vpop.permute.xlu0 %1050 }
0x15b1   :  { %1328 = vmatprep.mubr.msk.f32.mxu1 %vm153_vm3, %v1049_v24 }
0x15b2   :  { %1329 = vmatmul.mubr.msk.f32.vlgmr.msra.gmra.mxu1 %vm153_vm3, %v1051_v2 }
0x1672   :  { %v1330_v26 = vpop.f32.mrf.mxu1 }
0x1673   :  { %v1128_v4 = vadd.f32 %v1330_v26, %v1170_v25 }
0x1674   :  { %v1122_v27 = vpop.f32.mrf.mxu1 }
0x1675   :  { %v1174_v28 = vmul.f32 -1.442695, %v1128_v4  ;;  %v1123_v7 = vadd.f32 %v1170_v25, %v1122_v27 }
0x1677   :  { %1403 = vpow2.f32 %v1174_v28  ;;  %v1173_v0 = vmul.f32 -1.442695, %v1123_v7 }
0x1679   :  { %1405 = vpow2.f32 %v1173_v0 }
0x1684   :  { %v1404_v8 = vpop.eup %1403 }
0x1685   :  { %v1138_v29 = vadd.f32 1.0, %v1404_v8 }
0x1686   :  { %v1406_v36 = vpop.eup %1405 }
0x1687   :  { %1407 = vrcp.f32 %v1138_v29  ;;  %v1137_v30 = vadd.f32 1.0, %v1406_v36 }
0x1689   :  { %1409 = vrcp.f32 %v1137_v30 }
0x1694   :  { %v1408_v31 = vpop.eup %1407 }
0x1695   :  { %1145 = vst.msk [vmem:[%s1710_s6 + $0x8] sm:$0xff] %vm1143_vm10, %v1408_v31 }
0x1696   :  { %v1410_v32 = vpop.eup %1409 }
0x1697   :  { %1144 = vst.msk [vmem:[%s1710_s6] sm:$0xff] %vm1143_vm10, %v1410_v32 }
0x1698   :  { %1150 = vsyncpa [#allocation3], 1 }
0x1699   :  { %1151 = vsyncpa [#allocation5], 1 }

</bundles_post_ra>
